<compile_context>
chip_gen: v7x
topology: tpu7x:2x2x1
jax: 0.10.0
libtpu: 0.0.40
codegen_flags: <defaults>
</compile_context>

<pallas_src>
import functools

import jax
import jax.numpy as jnp
from jax.experimental import pallas as pl
from jax.experimental.pallas import tpu as pltpu

LANE = 128  # pad feature dims to this (matches v5e MXU 128-wide tiles; fine on v6e/v7x)


def _round_up(x, m):
    return (x + m - 1) // m * m


def _pad2(a, rows, cols, dtype=None):
    r, c = a.shape
    out = jnp.pad(a, ((0, rows - r), (0, cols - c)))
    return out.astype(dtype) if dtype is not None else out


def vae_kernel(x_ref, eps_ref,
               w1_ref, b1_ref, w23_ref, b23_ref,
               w4_ref, b4_ref, w5_ref, b5_ref,
               recon_ref, ml_ref, *, lat_pad):
    cdt = w1_ref.dtype  # compute dtype (bf16)

    # encoder: fc1 + relu
    h = jnp.dot(x_ref[...], w1_ref[...], preferred_element_type=jnp.float32) + b1_ref[...]
    h = jnp.maximum(h, 0.0).astype(cdt)

    # fused fc2|fc3 head: one matmul gives [mu | logvar]
    ml = jnp.dot(h, w23_ref[...], preferred_element_type=jnp.float32) + b23_ref[...]
    mu = ml[:, :lat_pad]
    logvar = ml[:, lat_pad:]

    # reparameterize: z = eps * exp(0.5*logvar) + mu   (f32)
    std = jnp.exp(0.5 * logvar)
    z = (eps_ref[...] * std + mu).astype(cdt)

    # decoder: fc4 + relu, fc5 + sigmoid
    h2 = jnp.dot(z, w4_ref[...], preferred_element_type=jnp.float32) + b4_ref[...]
    h2 = jnp.maximum(h2, 0.0).astype(cdt)
    logits = jnp.dot(h2, w5_ref[...], preferred_element_type=jnp.float32) + b5_ref[...]
    recon = pl.reciprocal(1.0 + jnp.exp(-logits), approx=True)  # sigmoid on EUP

    recon_ref[...] = recon.astype(recon_ref.dtype)
    ml_ref[...] = ml.astype(ml_ref.dtype)


def vae_forward(x, eps, params, *, block_b=512, compute_dtype=jnp.bfloat16):
    """x: [B, input_size] f32, eps: [B, latent_size] f32, params: dict of f32 weights.

    Weights are stored [in_features, out_features]; biases [1, out_features].
    Returns (recon, mu, logvar) in f32 at the original (unpadded) shapes.
    """
    B, input_size = x.shape
    hidden_size = params["w1"].shape[1]
    latent_size = params["w2"].shape[1]

    d_p = _round_up(input_size, LANE)
    h_p = _round_up(hidden_size, LANE)
    l_p = _round_up(latent_size, LANE)

    # batch tiling: weights stay resident, activation tiles are double-buffered.
    tb = min(_round_up(block_b, 8), _round_up(B, 8))
    b_p = _round_up(B, tb)
    grid = (b_p // tb,)

    # pad + cast operands (zero padding is exact: padded rows/cols contribute 0).
    x_p = _pad2(x, b_p, d_p, compute_dtype)
    eps_p = _pad2(eps, b_p, l_p, jnp.float32)

    w1 = _pad2(params["w1"], d_p, h_p, compute_dtype)
    b1 = _pad2(params["b1"], 1, h_p, jnp.float32)
    # fuse the mu / logvar heads into a single [h_p, 2*l_p] weight and bias.
    w23 = jnp.concatenate([_pad2(params["w2"], h_p, l_p, compute_dtype),
                           _pad2(params["w3"], h_p, l_p, compute_dtype)], axis=1)
    b23 = jnp.concatenate([_pad2(params["b2"], 1, l_p, jnp.float32),
                           _pad2(params["b3"], 1, l_p, jnp.float32)], axis=1)
    w4 = _pad2(params["w4"], l_p, h_p, compute_dtype)
    b4 = _pad2(params["b4"], 1, h_p, jnp.float32)
    w5 = _pad2(params["w5"], h_p, d_p, compute_dtype)
    b5 = _pad2(params["b5"], 1, d_p, jnp.float32)

    def batch_spec(cols):
        return pl.BlockSpec((tb, cols), lambda i: (i, 0))

    def resident_spec(a):
        # same block for every grid step -> stays in VMEM across the whole grid.
        return pl.BlockSpec(a.shape, lambda i: (0, 0))

    in_specs = [
        batch_spec(d_p),                     # x tile
        batch_spec(l_p),                     # eps tile
        resident_spec(w1), resident_spec(b1),
        resident_spec(w23), resident_spec(b23),
        resident_spec(w4), resident_spec(b4),
        resident_spec(w5), resident_spec(b5),
    ]
    out_specs = (
        batch_spec(d_p),                     # recon (padded)
        batch_spec(2 * l_p),                 # packed [mu | logvar] (padded)
    )
    out_shapes = (
        jax.ShapeDtypeStruct((b_p, d_p), jnp.float32),
        jax.ShapeDtypeStruct((b_p, 2 * l_p), jnp.float32),
    )

    recon_p, ml_p = pl.pallas_call(
        functools.partial(vae_kernel, lat_pad=l_p),
        out_shape=out_shapes,
        grid=grid,
        in_specs=in_specs,
        out_specs=out_specs,
        compiler_params=pltpu.CompilerParams(
            dimension_semantics=("parallel",)),  # batch tiles independent (v7x 2 TCs)
    )(x_p, eps_p, w1, b1, w23, b23, w4, b4, w5, b5)

    recon = recon_p[:B, :input_size]
    mu = ml_p[:B, :latent_size]
    logvar = ml_p[:B, l_p:l_p + latent_size]
    return recon, mu, logvar


def init_params(key, input_size, hidden_size, latent_size):
    """PyTorch nn.Linear default init (uniform +-1/sqrt(fan_in)).
    Weights stored [in_features, out_features]."""
    def linear(k, fan_in, fan_out):
        kw, kb = jax.random.split(k)
        bound = 1.0 / jnp.sqrt(fan_in)
        w = jax.random.uniform(kw, (fan_in, fan_out), jnp.float32, -bound, bound)
        b = jax.random.uniform(kb, (1, fan_out), jnp.float32, -bound, bound)
        return w, b

    k1, k2, k3, k4, k5 = jax.random.split(key, 5)
    w1, b1 = linear(k1, input_size, hidden_size)
    w2, b2 = linear(k2, hidden_size, latent_size)
    w3, b3 = linear(k3, hidden_size, latent_size)
    w4, b4 = linear(k4, latent_size, hidden_size)
    w5, b5 = linear(k5, hidden_size, input_size)
    return dict(w1=w1, b1=b1, w2=w2, b2=b2, w3=w3, b3=b3,
                w4=w4, b4=b4, w5=w5, b5=b5)


def vae_reference(x, eps, p, compute_dtype=jnp.float32):
    """Pure-JAX reference. With compute_dtype=bf16 it matches the kernel's cast
    pattern (bf16 matmul inputs, f32 accumulation)."""
    def dot(a, w):
        return jnp.dot(a.astype(compute_dtype), w.astype(compute_dtype),
                       preferred_element_type=jnp.float32)
    h = jnp.maximum(dot(x, p["w1"]) + p["b1"], 0.0)
    mu = dot(h, p["w2"]) + p["b2"]
    logvar = dot(h, p["w3"]) + p["b3"]
    z = eps * jnp.exp(0.5 * logvar) + mu
    h2 = jnp.maximum(dot(z, p["w4"]) + p["b4"], 0.0)
    logits = dot(h2, p["w5"]) + p["b5"]
    return 1.0 / (1.0 + jnp.exp(-logits)), mu, logvar


if __name__ == "__main__":
    B = 64                      # multiple of 16 -> full bf16 sublane packing
    input_size = 64
    hidden_size = 32
    latent_size = 16

    key = jax.random.PRNGKey(0)
    k_params, k_x, k_eps = jax.random.split(key, 3)

    params = init_params(k_params, input_size, hidden_size, latent_size)
    x = jax.random.normal(k_x, (B, input_size), jnp.float32)
    eps = jax.random.normal(k_eps, (B, latent_size), jnp.float32)  # torch.randn_like(std)

    # block_b=32 so the demo exercises a multi-step batch grid (grid=(2,)).
    recon, mu, logvar = vae_forward(x, eps, params, block_b=32)
    jax.block_until_ready((recon, mu, logvar))

    # correctness: compare against a bf16-matched pure-JAX reference
    # (tolerance covers the approx-reciprocal sigmoid and accumulation-order noise).
    r_ref, mu_ref, lv_ref = vae_reference(x, eps, params, compute_dtype=jnp.bfloat16)
    assert jnp.allclose(recon, r_ref, atol=5e-3, rtol=5e-3)
    assert jnp.allclose(mu, mu_ref, atol=5e-3, rtol=5e-3)
    assert jnp.allclose(logvar, lv_ref, atol=5e-3, rtol=5e-3)

    print("KERNEL_OK")
</pallas_src>

<mosaic_0001>
module attributes {stable_mosaic.version = 11 : i64} {
  func.func @vae_kernel(%arg0: i32, %arg1: memref<32x128xbf16, #tpu.memory_space<vmem>>, %arg2: memref<32x128xf32, #tpu.memory_space<vmem>>, %arg3: memref<128x128xbf16, #tpu.memory_space<vmem>>, %arg4: memref<1x128xf32, #tpu.memory_space<vmem>>, %arg5: memref<128x256xbf16, #tpu.memory_space<vmem>>, %arg6: memref<1x256xf32, #tpu.memory_space<vmem>>, %arg7: memref<128x128xbf16, #tpu.memory_space<vmem>>, %arg8: memref<1x128xf32, #tpu.memory_space<vmem>>, %arg9: memref<128x128xbf16, #tpu.memory_space<vmem>>, %arg10: memref<1x128xf32, #tpu.memory_space<vmem>>, %arg11: memref<32x128xf32, #tpu.memory_space<vmem>>, %arg12: memref<32x256xf32, #tpu.memory_space<vmem>>) attributes {dimension_semantics = [#tpu.dimension_semantics<parallel>], iteration_bounds = array<i64: 2>, scalar_prefetch = 0 : i64, scratch_operands = 0 : i64, tpu.core_type = #tpu.core_type<tc>, window_params = [{transform_indices = @transform_0, window_bounds = array<i64: 32, 128>}, {transform_indices = @transform_1, window_bounds = array<i64: 32, 128>}, {pipeline_mode = #tpu.pipeline_mode<synchronous>, transform_indices = @transform_2, window_bounds = array<i64: 128, 128>}, {pipeline_mode = #tpu.pipeline_mode<synchronous>, transform_indices = @transform_3, window_bounds = array<i64: 1, 128>}, {pipeline_mode = #tpu.pipeline_mode<synchronous>, transform_indices = @transform_4, window_bounds = array<i64: 128, 256>}, {pipeline_mode = #tpu.pipeline_mode<synchronous>, transform_indices = @transform_5, window_bounds = array<i64: 1, 256>}, {pipeline_mode = #tpu.pipeline_mode<synchronous>, transform_indices = @transform_6, window_bounds = array<i64: 128, 128>}, {pipeline_mode = #tpu.pipeline_mode<synchronous>, transform_indices = @transform_7, window_bounds = array<i64: 1, 128>}, {pipeline_mode = #tpu.pipeline_mode<synchronous>, transform_indices = @transform_8, window_bounds = array<i64: 128, 128>}, {pipeline_mode = #tpu.pipeline_mode<synchronous>, transform_indices = @transform_9, window_bounds = array<i64: 1, 128>}, {transform_indices = @transform_10, window_bounds = array<i64: 32, 128>}, {transform_indices = @transform_11, window_bounds = array<i64: 32, 256>}]} {
    %c0 = arith.constant 0 : index
    %c0_0 = arith.constant 0 : index
    %0 = vector.load %arg1[%c0, %c0_0] : memref<32x128xbf16, #tpu.memory_space<vmem>>, vector<32x128xbf16>
    %c0_1 = arith.constant 0 : index
    %c0_2 = arith.constant 0 : index
    %1 = vector.load %arg3[%c0_1, %c0_2] : memref<128x128xbf16, #tpu.memory_space<vmem>>, vector<128x128xbf16>
    %cst = arith.constant dense<0.000000e+00> : vector<32x128xf32>
    %2 = tpu.matmul %0, %1, %cst {dimension_numbers = #tpu.dot_dimension_numbers<[1], [0], [0], [1], [0, 0, 1, 1], [], []>} : vector<32x128xbf16>, vector<128x128xbf16>, vector<32x128xf32> -> vector<32x128xf32>
    %c0_3 = arith.constant 0 : index
    %c0_4 = arith.constant 0 : index
    %3 = vector.load %arg4[%c0_3, %c0_4] : memref<1x128xf32, #tpu.memory_space<vmem>>, vector<1x128xf32>
    %4 = vector.broadcast %3 : vector<1x128xf32> to vector<32x128xf32>
    %5 = arith.addf %2, %4 : vector<32x128xf32>
    %cst_5 = arith.constant 0.000000e+00 : f32
    %6 = vector.broadcast %cst_5 : f32 to vector<32x128xf32>
    %7 = arith.maximumf %5, %6 : vector<32x128xf32>
    %8 = arith.truncf %7 : vector<32x128xf32> to vector<32x128xbf16>
    %c0_6 = arith.constant 0 : index
    %c0_7 = arith.constant 0 : index
    %9 = vector.load %arg5[%c0_6, %c0_7] : memref<128x256xbf16, #tpu.memory_space<vmem>>, vector<128x256xbf16>
    %cst_8 = arith.constant dense<0.000000e+00> : vector<32x256xf32>
    %10 = tpu.matmul %8, %9, %cst_8 {dimension_numbers = #tpu.dot_dimension_numbers<[1], [0], [0], [1], [0, 0, 1, 1], [], []>} : vector<32x128xbf16>, vector<128x256xbf16>, vector<32x256xf32> -> vector<32x256xf32>
    %c0_9 = arith.constant 0 : index
    %c0_10 = arith.constant 0 : index
    %11 = vector.load %arg6[%c0_9, %c0_10] : memref<1x256xf32, #tpu.memory_space<vmem>>, vector<1x256xf32>
    %12 = vector.broadcast %11 : vector<1x256xf32> to vector<32x256xf32>
    %13 = arith.addf %10, %12 : vector<32x256xf32>
    %14 = vector.extract_strided_slice %13 {offsets = [0, 0], sizes = [32, 128], strides = [1, 1]} : vector<32x256xf32> to vector<32x128xf32>
    %15 = vector.extract_strided_slice %13 {offsets = [0, 128], sizes = [32, 128], strides = [1, 1]} : vector<32x256xf32> to vector<32x128xf32>
    %cst_11 = arith.constant 5.000000e-01 : f32
    %16 = vector.broadcast %cst_11 : f32 to vector<32x128xf32>
    %17 = arith.mulf %16, %15 : vector<32x128xf32>
    %18 = math.exp %17 : vector<32x128xf32>
    %c0_12 = arith.constant 0 : index
    %c0_13 = arith.constant 0 : index
    %19 = vector.load %arg2[%c0_12, %c0_13] : memref<32x128xf32, #tpu.memory_space<vmem>>, vector<32x128xf32>
    %20 = arith.mulf %19, %18 : vector<32x128xf32>
    %21 = arith.addf %20, %14 : vector<32x128xf32>
    %22 = arith.truncf %21 : vector<32x128xf32> to vector<32x128xbf16>
    %c0_14 = arith.constant 0 : index
    %c0_15 = arith.constant 0 : index
    %23 = vector.load %arg7[%c0_14, %c0_15] : memref<128x128xbf16, #tpu.memory_space<vmem>>, vector<128x128xbf16>
    %cst_16 = arith.constant dense<0.000000e+00> : vector<32x128xf32>
    %24 = tpu.matmul %22, %23, %cst_16 {dimension_numbers = #tpu.dot_dimension_numbers<[1], [0], [0], [1], [0, 0, 1, 1], [], []>} : vector<32x128xbf16>, vector<128x128xbf16>, vector<32x128xf32> -> vector<32x128xf32>
    %c0_17 = arith.constant 0 : index
    %c0_18 = arith.constant 0 : index
    %25 = vector.load %arg8[%c0_17, %c0_18] : memref<1x128xf32, #tpu.memory_space<vmem>>, vector<1x128xf32>
    %26 = vector.broadcast %25 : vector<1x128xf32> to vector<32x128xf32>
    %27 = arith.addf %24, %26 : vector<32x128xf32>
    %cst_19 = arith.constant 0.000000e+00 : f32
    %28 = vector.broadcast %cst_19 : f32 to vector<32x128xf32>
    %29 = arith.maximumf %27, %28 : vector<32x128xf32>
    %30 = arith.truncf %29 : vector<32x128xf32> to vector<32x128xbf16>
    %c0_20 = arith.constant 0 : index
    %c0_21 = arith.constant 0 : index
    %31 = vector.load %arg9[%c0_20, %c0_21] : memref<128x128xbf16, #tpu.memory_space<vmem>>, vector<128x128xbf16>
    %cst_22 = arith.constant dense<0.000000e+00> : vector<32x128xf32>
    %32 = tpu.matmul %30, %31, %cst_22 {dimension_numbers = #tpu.dot_dimension_numbers<[1], [0], [0], [1], [0, 0, 1, 1], [], []>} : vector<32x128xbf16>, vector<128x128xbf16>, vector<32x128xf32> -> vector<32x128xf32>
    %c0_23 = arith.constant 0 : index
    %c0_24 = arith.constant 0 : index
    %33 = vector.load %arg10[%c0_23, %c0_24] : memref<1x128xf32, #tpu.memory_space<vmem>>, vector<1x128xf32>
    %34 = vector.broadcast %33 : vector<1x128xf32> to vector<32x128xf32>
    %35 = arith.addf %32, %34 : vector<32x128xf32>
    %cst_25 = arith.constant 0.000000e+00 : f32
    %36 = vector.broadcast %cst_25 : f32 to vector<32x128xf32>
    %37 = arith.subf %36, %35 : vector<32x128xf32>
    %38 = math.exp %37 : vector<32x128xf32>
    %cst_26 = arith.constant 1.000000e+00 : f32
    %39 = vector.broadcast %cst_26 : f32 to vector<32x128xf32>
    %40 = arith.addf %39, %38 : vector<32x128xf32>
    %41 = tpu.reciprocal %40 {approx = true} : vector<32x128xf32> -> vector<32x128xf32>
    %c0_27 = arith.constant 0 : index
    %c0_28 = arith.constant 0 : index
    %42 = vector.load %arg11[%c0_27, %c0_28] : memref<32x128xf32, #tpu.memory_space<vmem>>, vector<32x128xf32>
    tpu.vector_store %arg11[%c0_27, %c0_28], %41 {strides = array<i32>} : memref<32x128xf32, #tpu.memory_space<vmem>>, vector<32x128xf32>,
    %c0_29 = arith.constant 0 : index
    %c0_30 = arith.constant 0 : index
    %43 = vector.load %arg12[%c0_29, %c0_30] : memref<32x256xf32, #tpu.memory_space<vmem>>, vector<32x256xf32>
    tpu.vector_store %arg12[%c0_29, %c0_30], %13 {strides = array<i32>} : memref<32x256xf32, #tpu.memory_space<vmem>>, vector<32x256xf32>,
    return
  }
  func.func @transform_0(%arg0: i32) -> (i32, i32) {
    %c0_i32 = arith.constant 0 : i32
    %c0_i32_0 = arith.constant 0 : i32
    return %arg0, %c0_i32 : i32, i32
  }
  func.func @transform_1(%arg0: i32) -> (i32, i32) {
    %c0_i32 = arith.constant 0 : i32
    %c0_i32_0 = arith.constant 0 : i32
    return %arg0, %c0_i32 : i32, i32
  }
  func.func @transform_2(%arg0: i32) -> (i32, i32) {
    %c0_i32 = arith.constant 0 : i32
    %c0_i32_0 = arith.constant 0 : i32
    %c0_i32_1 = arith.constant 0 : i32
    return %c0_i32, %c0_i32_0 : i32, i32
  }
  func.func @transform_3(%arg0: i32) -> (i32, i32) {
    %c0_i32 = arith.constant 0 : i32
    %c0_i32_0 = arith.constant 0 : i32
    %c0_i32_1 = arith.constant 0 : i32
    return %c0_i32, %c0_i32_0 : i32, i32
  }
  func.func @transform_4(%arg0: i32) -> (i32, i32) {
    %c0_i32 = arith.constant 0 : i32
    %c0_i32_0 = arith.constant 0 : i32
    %c0_i32_1 = arith.constant 0 : i32
    return %c0_i32, %c0_i32_0 : i32, i32
  }
  func.func @transform_5(%arg0: i32) -> (i32, i32) {
    %c0_i32 = arith.constant 0 : i32
    %c0_i32_0 = arith.constant 0 : i32
    %c0_i32_1 = arith.constant 0 : i32
    return %c0_i32, %c0_i32_0 : i32, i32
  }
  func.func @transform_6(%arg0: i32) -> (i32, i32) {
    %c0_i32 = arith.constant 0 : i32
    %c0_i32_0 = arith.constant 0 : i32
    %c0_i32_1 = arith.constant 0 : i32
    return %c0_i32, %c0_i32_0 : i32, i32
  }
  func.func @transform_7(%arg0: i32) -> (i32, i32) {
    %c0_i32 = arith.constant 0 : i32
    %c0_i32_0 = arith.constant 0 : i32
    %c0_i32_1 = arith.constant 0 : i32
    return %c0_i32, %c0_i32_0 : i32, i32
  }
  func.func @transform_8(%arg0: i32) -> (i32, i32) {
    %c0_i32 = arith.constant 0 : i32
    %c0_i32_0 = arith.constant 0 : i32
    %c0_i32_1 = arith.constant 0 : i32
    return %c0_i32, %c0_i32_0 : i32, i32
  }
  func.func @transform_9(%arg0: i32) -> (i32, i32) {
    %c0_i32 = arith.constant 0 : i32
    %c0_i32_0 = arith.constant 0 : i32
    %c0_i32_1 = arith.constant 0 : i32
    return %c0_i32, %c0_i32_0 : i32, i32
  }
  func.func @transform_10(%arg0: i32) -> (i32, i32) {
    %c0_i32 = arith.constant 0 : i32
    %c0_i32_0 = arith.constant 0 : i32
    return %arg0, %c0_i32 : i32, i32
  }
  func.func @transform_11(%arg0: i32) -> (i32, i32) {
    %c0_i32 = arith.constant 0 : i32
    %c0_i32_0 = arith.constant 0 : i32
    return %arg0, %c0_i32 : i32, i32
  }
}

</mosaic_0001>

<bundles_post_ra>
// kernel: tpu_custom_call.1
= control target key start
LH: loop header
LB: loop body
LE: loop exit
PB: predicated region body
PF: predicated region fallthrough
CT: control target
= control target key end

     0   :  { %s2466_s0 = inlined_call_operand.hbm [shape: bf16[64,128], index: 0, kind: input, shape index: {}]   ;;  %s2467_s1 = inlined_call_operand.hbm [shape: f32[64,128], index: 1, kind: input, shape index: {}]   ;;  %s2468_s2 = inlined_call_operand.hbm [shape: bf16[128,128], index: 2, kind: input, shape index: {}]   ;;  %s2469_s3 = inlined_call_operand.vmem [shape: f32[1,128], index: 3, kind: input, shape index: {}]   ;;  %s2470_s4 = inlined_call_operand.hbm [shape: bf16[128,256], index: 4, kind: input, shape index: {}]   ;;  %s2471_s5 = inlined_call_operand.vmem [shape: f32[1,256], index: 5, kind: input, shape index: {}]   ;;  %s2472_s6 = inlined_call_operand.hbm [shape: bf16[128,128], index: 6, kind: input, shape index: {}]   ;;  %s2473_s7 = inlined_call_operand.vmem [shape: f32[1,128], index: 7, kind: input, shape index: {}]   ;;  %s2474_s8 = inlined_call_operand.hbm [shape: bf16[128,128], index: 8, kind: input, shape index: {}]   ;;  %s2475_s9 = inlined_call_operand.vmem [shape: f32[1,128], index: 9, kind: input, shape index: {}]   ;;  %s2476_s10 = inlined_call_operand.hbm [shape: f32[64,128], index: 10, kind: output, shape index: {0}]   ;;  %s2477_s11 = inlined_call_operand.hbm [shape: f32[64,256], index: 11, kind: output, shape index: {1}]  }
   0x1   :  { %2490 = sst [smem:[#allocation25_spill]] %s2466_s0 }
   0x2   :  { %2491 = sst [smem:[#allocation26_spill]] %s2468_s2 }
   0x3   :  { %2492 = sst [smem:[#allocation27_spill]] %s2470_s4 }
   0x4   :  { %2493 = sst [smem:[#allocation28_spill]] %s2472_s6 }
   0x5   :  { %2494 = sst [smem:[#allocation29_spill]] %s2474_s8 }
   0x6   :  { %2495 = sst [smem:[#allocation30_spill]] %s2475_s9 }
   0x7   :  { %2496 = sst [smem:[#allocation31_spill]] %s2476_s10 }
   0x8   :  { %17 = vsyncpa [#allocation3], 0 }
   0x9   :  { %19 = vsyncpa [#allocation3 + $0x1], 0 }
   0xa   :  { %20 = vsyncpa [#allocation6], 0 }
   0xb   :  { %22 = vsyncpa [#allocation6 + $0x1], 0 }
   0xc   :  { %23 = vsyncpa [#allocation9], 0 }
   0xd   :  { %24 = vsyncpa [#allocation12], 0 }
   0xe   :  { %25 = vsyncpa [#allocation4], 0 }
   0xf   :  { %27 = vsyncpa [#allocation4 + $0x1], 0 }
  0x10   :  { %28 = vsyncpa [#allocation15], 0 }
  0x11   :  { %30 = vsyncpa [#allocation15 + $0x1], 0  ;;  %s2044_s17 = smov 0   ;;  %s2046_s18 = smov 0  }
  0x12   :  { %s2048_s19 = smov 0   ;;  %s2050_s20 = smov 0  }
  0x13 LB: > { %2497 = sst [smem:[#allocation23_spill]] %s1953_s17  ;;  %s2065_s21 = sadd.s32 4294967295, %s1965_s20   ;;  %s1965_s20 = sphi %s2050_s20, %s2534_s20   ;;  %s1961_s19 = sphi %s2048_s19, %s2533_s19   ;;  %s1957_s18 = sphi %s2046_s18, %s2532_s18   ;;  %s1953_s17 = sphi %s2044_s17, %s2531_s17  }
  0x14   : > { %s1328_s22 = sadd.s32 4294967294, %s1965_s20   ;;  %p56_p0 = scmp.ne.s32.totalorder %s1957_s18, %s1953_s17 }
  0x15   : > { %p2478_p1 = scmp.eq.s32.totalorder %s2065_s21, 0  ;;  %p280_p3 = scmp.eq.s32.totalorder %s1328_s22, 1 }
  0x16   : > { %p1329_p5 = scmp.ge.s32.totalorder %s1965_s20, 1  ;;  %p313_p7 = scmp.lt.s32.totalorder %s1965_s20, 3 }
  0x17   : > { %p2074_p4 = por %p2478_p1, %p56_p0  ;;  %p2079_p6 = por %p280_p3, %p56_p0 }
  0x18   : > { %p2084_p8 = pnand %p1329_p5, %p313_p7  ;;  %s1967_s26 = smov [#allocation7]  }
  0x19   : > { %s2498_s23 = scalar_select %p2074_p4, 1, 0 }
  0x1a   : > { %s2499_s24 = scalar_select %p2079_p6, 1, 0 }
  0x1b   : > { %s2501_s25 = scalar_select %p2084_p8, 1, 0 }
  0x1c   : > { %2500 = sst [smem:[#allocation24_spill]] %s2499_s24  ;;  %s325_s27 = sshll.u32 %s1967_s26, 4  ;;  %s2088_s27 = int_to_ptr.vmem [resolvable:$true] %s325_s27 }
  0x1d   : > { %p1523_p9 = pneg %p2084_p8  ;;  %s1968_s29 = smov [#allocation8]  }
  0x1e   : > { %s341_s30 = sshll.u32 %s1968_s29, 4  ;;  %s2503_s2 = sld [smem:[#allocation26_spill]]  ;;  %s2099_s30 = int_to_ptr.vmem [resolvable:$true] %s341_s30 }
  0x1f   : > { %p2095_p11 = pnand %p1523_p9, %p2478_p1 }
  0x21   : > { %p2109_p13 = pneg %p2095_p11 }
  0x24   : > { %s1679_s14 = scalar_lea.hbm %s2503_s2, 1024 }
  0x25   : > { %p1680_p12 = scmp.ne.s32.totalorder %s2503_s2, %s1679_s14  ;;  %p1686_p5 = scmp.lt.u32.totalorder %s1679_s14, %s2503_s2 }
  0x27   : > { %p1682_p0 = pnand %p2109_p13, %p1680_p12 }
  0x29   : > { %p1683_p3 = pneg %p1682_p0 }
  0x2b   : > { %p1688_p7 = pnand %p1686_p5, %p1683_p3 }
  0x2d   : > { %1691 = shalt.err (!%p1688_p7)
}
  0x2e   : > { %s1692_s12 = scalar_lea.vmem %s2088_s27, 1024  ;;  %p1700_p2 = scmp.lt.s32.totalorder %s2088_s27, %s2088_s27 }
  0x2f   : > { %p1693_p9 = scmp.ne.s32.totalorder %s2088_s27, %s1692_s12  ;;  %p1701_p6 = scmp.lt.s32.totalorder %s1692_s12, %s1692_s12 }
  0x31   : > { %p1695_p10 = pnand %p1693_p9, %p2109_p13  ;;  %p1702_p12 = por %p1701_p6, %p1700_p2 }
  0x33   : > { %p1696_p1 = pneg %p1695_p10 }
  0x35   : > { %p1703_p0 = pnand %p1702_p12, %p1696_p1 }
  0x37   : > { %1706 = shalt.err (!%p1703_p0)
}
  0x38   : > { %s2482_s13 = smov 64   ;;  %s2484_s14 = smov 4  }
  0x39   : > { %1526 = dma.hbm_to_vmem [thread:$0]  (!%p2095_p11), %s2503_s2, 1024, %s2088_s27, [#allocation6], %s2482_s13, %s2482_s13, %s2484_s14  }
  0x3a   : > { %s2505_s4 = sld [smem:[#allocation27_spill]] }
  0x40   : > { %s1707_s12 = scalar_lea.hbm %s2505_s4, 2048 }
  0x41   : > { %p1708_p1 = scmp.ne.s32.totalorder %s2505_s4, %s1707_s12  ;;  %p1714_p10 = scmp.lt.u32.totalorder %s1707_s12, %s2505_s4 }
  0x43   : > { %p1710_p2 = pnand %p1708_p1, %p2109_p13 }
  0x45   : > { %p1711_p6 = pneg %p1710_p2 }
  0x47   : > { %p1716_p3 = pnand %p1714_p10, %p1711_p6 }
  0x49   : > { %1719 = shalt.err (!%p1716_p3)
}
  0x4a   : > { %s1720_s27 = scalar_lea.vmem %s2099_s30, 2048  ;;  %p1728_p12 = scmp.lt.s32.totalorder %s2099_s30, %s2099_s30 }
  0x4b   : > { %p1721_p5 = scmp.ne.s32.totalorder %s2099_s30, %s1720_s27  ;;  %p1729_p0 = scmp.lt.s32.totalorder %s1720_s27, %s1720_s27 }
  0x4d   : > { %p1723_p7 = pnand %p1721_p5, %p2109_p13  ;;  %p1730_p1 = por %p1729_p0, %p1728_p12 }
  0x4f   : > { %p1724_p9 = pneg %p1723_p7 }
  0x51   : > { %p1731_p2 = pnand %p1730_p1, %p1724_p9 }
  0x53   : > { %1734 = shalt.err (!%p1731_p2)
}
  0x54   : > { %s2488_s17 = smov 128   ;;  %s2489_s9 = smov 8  }
  0x55   : > { %1529 = dma.hbm_to_vmem [thread:$0]  (!%p2095_p11), %s2505_s4, 2048, %s2099_s30, [#allocation9], %s2488_s17, %s2488_s17, %s2489_s9  }
  0x56   : > { %s1973_s15 = smov [#allocation10]   ;;  %s1974_s26 = smov [#allocation11]  }
  0x57   : > { %s357_s16 = sshll.u32 %s1973_s15, 4  ;;  %s373_s29 = sshll.u32 %s1974_s26, 4  ;;  %s358_s16 = int_to_ptr.vmem [resolvable:$true] %s357_s16  ;;  %s2159_s29 = int_to_ptr.vmem [resolvable:$true] %s373_s29 }
  0x58   : > { %s2506_s6 = sld [smem:[#allocation28_spill]] }
  0x5e   : > { %s1735_s13 = scalar_lea.hbm %s2506_s6, 1024 }
  0x5f   : > { %p1736_p6 = scmp.ne.s32.totalorder %s2506_s6, %s1735_s13  ;;  %p1742_p5 = scmp.lt.u32.totalorder %s1735_s13, %s2506_s6 }
  0x61   : > { %p1738_p10 = pnand %p1736_p6, %p2109_p13 }
  0x63   : > { %p1739_p3 = pneg %p1738_p10 }
  0x65   : > { %p1744_p7 = pnand %p1742_p5, %p1739_p3 }
  0x67   : > { %1747 = shalt.err (!%p1744_p7)
}
  0x68   : > { %s1748_s24 = scalar_lea.vmem %s358_s16, 1024  ;;  %p1756_p1 = scmp.lt.s32.totalorder %s358_s16, %s358_s16 }
  0x69   : > { %p1749_p9 = scmp.ne.s32.totalorder %s358_s16, %s1748_s24  ;;  %p1757_p2 = scmp.lt.s32.totalorder %s1748_s24, %s1748_s24 }
  0x6b   : > { %p1751_p12 = pnand %p1749_p9, %p2109_p13  ;;  %p1758_p4 = por %p1757_p2, %p1756_p1 }
  0x6d   : > { %p1752_p0 = pneg %p1751_p12 }
  0x6f   : > { %p1759_p8 = pnand %p1758_p4, %p1752_p0 }
  0x71   : > { %1762 = shalt.err (!%p1759_p8)
}
  0x72   : > { %s2507_s2 = smov 4   ;;  %s2508_s14 = smov 64  }
  0x73   : > { %1532 = dma.hbm_to_vmem [thread:$0]  (!%p2095_p11), %s2506_s6, 1024, %s358_s16, [#allocation9], %s2508_s14, %s2508_s14, %s2507_s2  }
  0x74   : > { %s2509_s8 = sld [smem:[#allocation29_spill]] }
  0x7a   : > { %s1763_s27 = scalar_lea.hbm %s2509_s8, 1024 }
  0x7b   : > { %p1764_p6 = scmp.ne.s32.totalorder %s2509_s8, %s1763_s27  ;;  %p1770_p10 = scmp.lt.u32.totalorder %s1763_s27, %s2509_s8 }
  0x7d   : > { %p1766_p4 = pnand %p1764_p6, %p2109_p13 }
  0x7f   : > { %p1767_p8 = pneg %p1766_p4 }
  0x81   : > { %p1772_p3 = pnand %p1770_p10, %p1767_p8 }
  0x83   : > { %1775 = shalt.err (!%p1772_p3)
}
  0x84   : > { %s1776_s16 = scalar_lea.vmem %s2159_s29, 1024  ;;  %p1784_p12 = scmp.lt.s32.totalorder %s2159_s29, %s2159_s29 }
  0x85   : > { %p1777_p5 = scmp.ne.s32.totalorder %s2159_s29, %s1776_s16  ;;  %p1785_p0 = scmp.lt.s32.totalorder %s1776_s16, %s1776_s16 }
  0x87   : > { %p1779_p7 = pnand %p1777_p5, %p2109_p13  ;;  %p1786_p1 = por %p1785_p0, %p1784_p12 }
  0x89   : > { %p1780_p9 = pneg %p1779_p7 }
  0x8b   : > { %p1787_p2 = pnand %p1786_p1, %p1780_p9 }
  0x8d   : > { %1790 = shalt.err (!%p1787_p2)
}
  0x8e   : > { %1535 = dma.hbm_to_vmem [thread:$0]  (!%p2095_p11), %s2509_s8, 1024, %s2159_s29, [#allocation12], %s2508_s14, %s2508_s14, %s2507_s2  }
  0x8f   : > { %s2209_s28 = sadd.s32 1, %s1965_s20   ;;  %s43_s13 = sadd.s32 1, %s1961_s19 }
  0x90   : > { %s40_s22 = ssub.s32 %s1965_s20, %s2209_s28  ;;  %p50_p6 = scmp.ne.s32.totalorder %s1961_s19, %s1957_s18 }
  0x91   : > { %p41_p13 = scmp.eq.s32.totalorder %s40_s22, 0  ;;  %p51_p4 = scmp.eq.s32.totalorder %s1965_s20, 0 }
  0x92   : > { %p2510_p10 = scmp.eq.s32.totalorder %s2065_s21, 1  ;;  %p1554_p5 = scmp.lt.s32.totalorder %s1965_s20, 2 }
  0x93   : > { %s2218_s26 = scalar_select %p41_p13, %s1961_s19, %s43_s13  }
  0x94   : > { %p52_p8 = por %p51_p4, %p50_p6  ;;  %p2222_p3 = por %p2510_p10, %p50_p6 }
  0x95   : > { %s2228_s27 = sand.u32 1, %s1961_s19   ;;  %s1404_s10 = sshll.u32 %s1965_s20, 8 }
  0x96   : > { %s1335_s29 = sshll.u32 %s2228_s27, 4  ;;  %s2512_s0 = sld [smem:[#allocation25_spill]] }
  0x97   : > { %s394_s17 = scalar_lea.vmem [#allocation2], %s1335_s29  ;;  %p2239_p11 = pnand %p1554_p5, %p52_p8 }
  0x98   : > { %s401_s15 = sshll.u32 %s394_s17, 4  ;;  %s1338_s9 = sshll.u32 %s2228_s27, 5  ;;  %s2237_s15 = int_to_ptr.vmem [resolvable:$true] %s401_s15 }
  0x99   : > { %s391_s4 = scalar_lea.sflag [#allocation3], %s2228_s27  ;;  %p1793_p9 = pneg %p2239_p11 }
  0x9c   : > { %s2235_s16 = scalar_lea.hbm %s2512_s0, %s1404_s10  ;;  %s1796_s24 = scalar_lea.hbm %s2512_s0, 512 }
  0x9d   : > { %s1791_s30 = scalar_lea.hbm %s2235_s16, 256  ;;  %p1797_p1 = scmp.lt.u32.totalorder %s2235_s16, %s2512_s0 }
  0x9e   : > { %p1792_p7 = scmp.ne.s32.totalorder %s2235_s16, %s1791_s30  ;;  %p1798_p2 = scmp.lt.u32.totalorder %s1796_s24, %s1791_s30 }
  0x9f   : > { %p1800_p6 = scmp.lt.u32.totalorder %s1791_s30, %s2235_s16 }
  0xa0   : > { %p1794_p12 = pnand %p1793_p9, %p1792_p7  ;;  %p1799_p13 = por %p1798_p2, %p1797_p1 }
  0xa2   : > { %p1795_p0 = pneg %p1794_p12  ;;  %p1801_p4 = por %p1800_p6, %p1799_p13 }
  0xa4   : > { %p1802_p8 = pnand %p1801_p4, %p1795_p0 }
  0xa6   : > { %1805 = shalt.err (!%p1802_p8)
}
  0xa7   : > { %s1806_s13 = scalar_lea.vmem %s2237_s15, 256  ;;  %s1975_s29 = smov [#allocation2]  }
  0xa8   : > { %p1807_p10 = scmp.ne.s32.totalorder %s2237_s15, %s1806_s13  ;;  %s1811_s10 = sshll.u32 %s1975_s29, 4  ;;  %s1812_s10 = int_to_ptr.vmem [resolvable:$false] %s1811_s10 }
  0xa9   : > { %s1813_s6 = scalar_lea.vmem %s1812_s10, 512  ;;  %p1814_p12 = scmp.lt.s32.totalorder %s2237_s15, %s1812_s10 }
  0xaa   : > { %p1809_p5 = pnand %p1807_p10, %p1793_p9  ;;  %p1815_p1 = scmp.lt.s32.totalorder %s1813_s6, %s1806_s13 }
  0xac   : > { %p1810_p7 = pneg %p1809_p5  ;;  %p1816_p2 = por %p1815_p1, %p1814_p12 }
  0xae   : > { %p1817_p13 = pnand %p1816_p2, %p1810_p7 }
  0xb0   : > { %1820 = shalt.err (!%p1817_p13)
}
  0xb1   : > { %1539 = dma.hbm_to_vmem [thread:$0]  (!%p2239_p11), %s2235_s16, 256, %s2237_s15, %s391_s4, %s2508_s14, %s2508_s14, %s2507_s2  }
  0xb2   : > { %s1405_s30 = sshll.u32 %s1965_s20, 9  ;;  %s415_s29 = scalar_lea.vmem [#allocation5], %s1338_s9 }
  0xb3   : > { %s2280_s17 = scalar_lea.hbm %s2467_s1, %s1405_s30  ;;  %s422_s10 = sshll.u32 %s415_s29, 4  ;;  %s2284_s10 = int_to_ptr.vmem [resolvable:$true] %s422_s10 }
  0xb4   : > { %s2514_s6 = sand.u32 1, %s1965_s20   ;;  %s1821_s8 = scalar_lea.hbm %s2280_s17, 512 }
  0xb5   : > { %s2288_s0 = scalar_lea.sflag [#allocation6], %s2514_s6  ;;  %p1822_p0 = scmp.ne.s32.totalorder %s2280_s17, %s1821_s8 }
  0xb6   : > { %s1826_s14 = scalar_lea.hbm %s2467_s1, 1024  ;;  %p1827_p8 = scmp.lt.u32.totalorder %s2280_s17, %s2467_s1 }
  0xb7   : > { %p1824_p6 = pnand %p1822_p0, %p1793_p9  ;;  %p1828_p10 = scmp.lt.u32.totalorder %s1826_s14, %s1821_s8 }
  0xb8   : > { %p1830_p7 = scmp.lt.u32.totalorder %s1821_s8, %s2280_s17 }
  0xb9   : > { %p1825_p4 = pneg %p1824_p6  ;;  %p1829_p5 = por %p1828_p10, %p1827_p8 }
  0xbb   : > { %p1831_p12 = por %p1830_p7, %p1829_p5 }
  0xbd   : > { %p1832_p1 = pnand %p1831_p12, %p1825_p4 }
  0xbf   : > { %1835 = shalt.err (!%p1832_p1)
}
  0xc0   : > { %s1836_s9 = scalar_lea.vmem %s2284_s10, 512  ;;  %s1976_s15 = smov [#allocation5]  }
  0xc1   : > { %p1837_p2 = scmp.ne.s32.totalorder %s2284_s10, %s1836_s9  ;;  %s1841_s30 = sshll.u32 %s1976_s15, 4  ;;  %s1842_s30 = int_to_ptr.vmem [resolvable:$false] %s1841_s30 }
  0xc2   : > { %s1843_s24 = scalar_lea.vmem %s1842_s30, 1024  ;;  %p1844_p6 = scmp.lt.s32.totalorder %s2284_s10, %s1842_s30 }
  0xc3   : > { %p1839_p13 = pnand %p1837_p2, %p1793_p9  ;;  %p1845_p8 = scmp.lt.s32.totalorder %s1843_s24, %s1836_s9 }
  0xc5   : > { %p1840_p0 = pneg %p1839_p13  ;;  %p1846_p10 = por %p1845_p8, %p1844_p6 }
  0xc7   : > { %p1847_p5 = pnand %p1846_p10, %p1840_p0 }
  0xc9   : > { %1850 = shalt.err (!%p1847_p5)
}
  0xca   : > { %s2515_s8 = smov 8   ;;  %s2516_s13 = smov 128  }
  0xcb   : > { %1542 = dma.hbm_to_vmem [thread:$0]  (!%p2239_p11), %s2280_s17, 512, %s2284_s10, %s2288_s0, %s2516_s13, %s2516_s13, %s2515_s8  }
  0xcc   : > { %p2517_p9 = scmp.ne.s32.totalorder %s2501_s25, 0 }
  0xcd   : > { %s2320_s29 = sand.u32 (!%p2517_p9), 1, %s1957_s18   ;;  %p2518_p4 = scmp.ne.s32.totalorder (!%p2517_p9), %s2498_s23, 0 }
  0xce   : > { %434 = sbr.rel (%p2517_p9) target bundleno = 1209 (0x4b9), region = 60  ;;  %s1342_s6 = sshll.u32 (!%p2517_p9), %s2320_s29, 4 }
  0xcf   : > { %s437_s4 = scalar_lea.sflag (!%p2517_p9), [#allocation3], %s2320_s29  ;;  %s2324_s2 = scalar_lea.vmem (!%p2517_p9), [#allocation2], %s1342_s6 }
  0xd5   : > { %1924 = dma.done.wait (%p2518_p4), %s437_s4, 256  }
  0xd6   : > { %1926 = vsyncadd (%p2518_p4), %s437_s4, 4294967040  ;;  %s445_s0 = sand.u32 1, %s2065_s21   ;;  %s1343_s25 = sshll.u32 %s2320_s29, 5 }
  0xd7   : > { %s446_s22 = scalar_lea.sflag [#allocation6], %s445_s0  ;;  %s2334_s17 = scalar_lea.vmem [#allocation5], %s1343_s25 }
  0xd8   : > { %1928 = dma.done.wait (%p2518_p4), %s446_s22, 512  }
  0xd9   : > { %1930 = vsyncadd (%p2518_p4), %s446_s22, 4294966784  ;;  %p2519_p11 = scmp.eq.s32.totalorder %s2065_s21, 0 }
  0xdb   : > { %1932 = dma.done.wait (%p2519_p11), [#allocation6], 1024   ;;  %p2520_p7 = pmov %p2519_p11 }
  0xdd   : > { %1934 = vsyncadd (%p2520_p7), [#allocation6], 4294966272  ;;  %p2521_p12 = pmov %p2520_p7 }
  0xde   : > { %p2522_p1 = pmov %p2520_p7 }
  0xdf   : > { %1936 = dma.done.wait (%p2521_p12), [#allocation9], 3072  }
  0xe0   : > { %1938 = vsyncadd (%p2522_p1), [#allocation9], 4294964224  ;;  %p2523_p2 = pmov %p2522_p1 }
  0xe1   : > { %p2524_p13 = pmov %p2522_p1 }
  0xe2   : > { %1940 = dma.done.wait (%p2523_p2), [#allocation12], 1024  }
  0xe3   : > { %1942 = vsyncadd (%p2524_p13), [#allocation12], 4294966272  ;;  %v1605_v0 = vld [vmem:[#allocation7] sm:$0xff]   ;;  %v1606_v1 = vld [vmem:[#allocation7 + $0x8] sm:$0xff]   ;;  %v1977_v26 = vmov 0   ;;  %v679_v56 = vlaneseq  ;;  %s1349_s16 = sshll.u32 %s2320_s29, 6 }
  0xe4   : > { %1439 = vmatprep.subr.bf16.mxu0 %v1605_v0  ;;  %v1607_v2 = vld [vmem:[#allocation7 + $0x10] sm:$0xff]   ;;  %v1608_v3 = vld [vmem:[#allocation7 + $0x18] sm:$0xff]   ;;  %v1615_v5 = vld [vmem:[#allocation8 + $0x4] ss:$8 sps:$4 sm:$0xff]   ;;  %801 = vmatprep.mubr.bf16.mxu1 %v1977_v26  ;;  %s2361_s9 = scalar_lea.vmem [#allocation14], %s1349_s16  ;;  %s1408_s8 = sshll.u32 %s2065_s21, 10 }
  0xe5   : > { %1440 = vmatpush3.bf16.msra.mxu0 %v1605_v0  ;;  %v1613_v4 = vld [vmem:[%s2324_s2] sm:$0xff]   ;;  %769 = vmatprep.subr.bf16.mxu1 %v1615_v5  ;;  %v1610_v11 = vld [vmem:[#allocation7 + $0x28] sm:$0xff]   ;;  %v1612_v17 = vld [vmem:[#allocation7 + $0x38] sm:$0xff]   ;;  %v680_v57 = vshrl.u32 %v679_v56, 7  ;;  %s1162_s24 = sshll.u32 %s2361_s9, 4  ;;  %s2385_s4 = scalar_lea.hbm %s2477_s11, %s1408_s8  ;;  %s2379_s24 = int_to_ptr.vmem [resolvable:$true] %s1162_s24 }
  0xe6   : > { %1441 = vmatprep.subr.bf16.mxu0 %v1606_v1  ;;  %1455 = vmatprep.mubr.bf16.mxu0 %v1613_v4  ;;  %v1617_v6 = vld [vmem:[#allocation8] ss:$8 sps:$4 sm:$0xff]   ;;  %v1618_v8 = vld [vmem:[#allocation8 + $0x14] ss:$8 sps:$4 sm:$0xff]   ;;  %v1620_v9 = vld [vmem:[#allocation8 + $0x10] ss:$8 sps:$4 sm:$0xff]  }
  0xe7   : > { %v1609_v7 = vld [vmem:[#allocation7 + $0x20] sm:$0xff]   ;;  %770 = vmatpush1.bf16.msra.mxu1 %v1617_v6  ;;  %v1624_v13 = vld [vmem:[#allocation8 + $0x34] ss:$8 sps:$4 sm:$0xff]   ;;  %v1626_v15 = vld [vmem:[#allocation8 + $0x30] ss:$8 sps:$4 sm:$0xff]   ;;  %v681_v58 = vsub.s32 0, %v680_v57 }
  0xe8   : > { %771 = vmatprep.subr.bf16.mxu1 %v1618_v8  ;;  %v1621_v10 = vld [vmem:[#allocation8 + $0x24] ss:$8 sps:$4 sm:$0xff]   ;;  %v1623_v12 = vld [vmem:[#allocation8 + $0x20] ss:$8 sps:$4 sm:$0xff]   ;;  %v1611_v14 = vld [vmem:[#allocation7 + $0x30] sm:$0xff]   ;;  %v685_v60 = vsub.s32 1, %v680_v57 }
  0xe9   : > { %1442 = vmatpush3.bf16.msra.mxu0 %v1606_v1  ;;  %v1627_v16 = vld [vmem:[#allocation8 + $0x44] ss:$8 sps:$4 sm:$0xff]   ;;  %v1629_v18 = vld [vmem:[#allocation8 + $0x40] ss:$8 sps:$4 sm:$0xff]   ;;  %v1630_v19 = vld [vmem:[#allocation8 + $0x54] ss:$8 sps:$4 sm:$0xff]  }
  0xea   : > { %1443 = vmatprep.subr.bf16.mxu0 %v1607_v2  ;;  %v1632_v20 = vld [vmem:[#allocation8 + $0x50] ss:$8 sps:$4 sm:$0xff]   ;;  %v1633_v22 = vld [vmem:[#allocation8 + $0x64] ss:$8 sps:$4 sm:$0xff]   ;;  %v1635_v23 = vld [vmem:[#allocation8 + $0x60] ss:$8 sps:$4 sm:$0xff]  }
  0xeb   : > { %772 = vmatpush1.bf16.msra.mxu1 %v1620_v9  ;;  %v1614_v21 = vld [vmem:[%s2324_s2 + $0x8] sm:$0xff]   ;;  %v1350_v27 = vld [vmem:[%s2469_s3] ss:$0 sm:$0xff]  ;;  %v1641_v44 = vld [vmem:[#allocation10 + $0x10] sm:$0xff]   ;;  %s1132_s2 = scalar_lea.sflag [#allocation15], %s2320_s29  ;;  %s1851_s0 = scalar_lea.vmem %s2379_s24, 1024 }
  0xec   : > { %773 = vmatprep.subr.bf16.mxu1 %v1621_v10  ;;  %v1636_v24 = vld [vmem:[#allocation8 + $0x74] ss:$8 sps:$4 sm:$0xff]   ;;  %v1638_v25 = vld [vmem:[#allocation8 + $0x70] ss:$8 sps:$4 sm:$0xff]   ;;  %v1639_v42 = vld [vmem:[#allocation10] sm:$0xff]   ;;  %p1852_p0 = scmp.ne.s32.totalorder %s2379_s24, %s1851_s0  ;;  %s1978_s22 = smov [#allocation14]  }
  0xed   : > { %1444 = vmatpush3.bf16.msra.mxu0 %v1607_v2  ;;  %v1640_v43 = vld [vmem:[#allocation10 + $0x8] sm:$0xff]   ;;  %v1642_v45 = vld [vmem:[#allocation10 + $0x18] sm:$0xff]   ;;  %v1643_v46 = vld [vmem:[#allocation10 + $0x20] sm:$0xff]  }
  0xee   : > { %1445 = vmatprep.subr.bf16.mxu0 %v1608_v3  ;;  %v1644_v47 = vld [vmem:[#allocation10 + $0x28] sm:$0xff]   ;;  %v1645_v48 = vld [vmem:[#allocation10 + $0x30] sm:$0xff]   ;;  %v1646_v49 = vld [vmem:[#allocation10 + $0x38] sm:$0xff]   ;;  %p1853_p6 = pnand %p1852_p0, %p2222_p3 }
  0xef   : > { %774 = vmatpush1.bf16.msra.mxu1 %v1623_v12  ;;  %v1647_v50 = vld [vmem:[#allocation11] sm:$0xff]   ;;  %v1648_v51 = vld [vmem:[#allocation11 + $0x8] sm:$0xff]   ;;  %v1649_v52 = vld [vmem:[#allocation11 + $0x10] sm:$0xff]  }
  0xf0   : > { %775 = vmatprep.subr.bf16.mxu1 %v1624_v13  ;;  %v1650_v53 = vld [vmem:[#allocation11 + $0x18] sm:$0xff]   ;;  %v1651_v54 = vld [vmem:[#allocation11 + $0x20] sm:$0xff]   ;;  %v1652_v55 = vld [vmem:[#allocation11 + $0x28] sm:$0xff]   ;;  %p1854_p8 = pneg %p1853_p6 }
  0xf1   : > { %1446 = vmatpush3.bf16.msra.mxu0 %v1608_v3  ;;  %v677_v59 = vld [vmem:[%s2471_s5] sm:$0x3] }
  0xf2   : > { %1447 = vmatprep.subr.bf16.mxu0 %v1609_v7  ;;  %v682_v61 = vrot.slane %v677_v59, %v681_v58  ;;  %v686_v62 = vrot.slane %v677_v59, %v685_v60 }
  0xf3   : > { %776 = vmatpush1.bf16.msra.mxu1 %v1626_v15 }
  0xf4   : > { %777 = vmatprep.subr.bf16.mxu1 %v1627_v16 }
  0xf5   : > { %1448 = vmatpush3.bf16.msra.mxu0 %v1609_v7 }
  0xf6   : > { %1449 = vmatprep.subr.bf16.mxu0 %v1610_v11 }
  0xf7   : > { %778 = vmatpush1.bf16.msra.mxu1 %v1629_v18 }
  0xf8   : > { %779 = vmatprep.subr.bf16.mxu1 %v1630_v19 }
  0xf9   : > { %1450 = vmatpush3.bf16.msra.mxu0 %v1610_v11 }
  0xfa   : > { %1451 = vmatprep.subr.bf16.mxu0 %v1611_v14 }
  0xfb   : > { %780 = vmatpush1.bf16.msra.mxu1 %v1632_v20 }
  0xfc   : > { %781 = vmatprep.subr.bf16.mxu1 %v1633_v22 }
  0xfd   : > { %1452 = vmatpush3.bf16.msra.mxu0 %v1611_v14 }
  0xfe   : > { %1453 = vmatprep.subr.bf16.mxu0 %v1612_v17 }
  0xff   : > { %782 = vmatpush1.bf16.msra.mxu1 %v1635_v23  ;;  %v834_v23 = vld [vmem:[%s2334_s17] sm:$0xff] }
 0x100   : > { %783 = vmatprep.subr.bf16.mxu1 %v1636_v24 }
 0x101   : > { %1454 = vmatpush3.bf16.msra.mxu0 %v1612_v17 }
 0x102   : > { %1459 = vmatprep.subr.bf16.mxu0 %v1639_v42 }
 0x103   : > { %784 = vmatpush1.bf16.msra.mxu1 %v1638_v25  ;;  %v835_v25 = vld [vmem:[%s2334_s17 + $0x8] sm:$0xff] }
 0x104   : > { %1456 = vmatmul.mubr.bf16.vlgmr.msra.gmra.mrb[0].mxu0 %v1614_v21  ;;  %1479 = vmatprep.subr.bf16.mxu1 %v1647_v50 }
 0x105   : > { %1460 = vmatpush3.bf16.msra.mxu0 %v1639_v42  ;;  %v1654_v42 = vld [vmem:[#allocation11 + $0x38] sm:$0xff]  }
 0x106   : > { %1461 = vmatprep.subr.bf16.mxu0 %v1640_v43 }
 0x109   : > { %1462 = vmatpush3.bf16.msra.mxu0 %v1640_v43  ;;  %v1377_v43 = vld [vmem:[%s2473_s7] ss:$0 sm:$0xff] }
 0x10a   : > { %1463 = vmatprep.subr.bf16.mxu0 %v1641_v44 }
 0x10d   : > { %1464 = vmatpush3.bf16.msra.mxu0 %v1641_v44 }
 0x10e   : > { %1465 = vmatprep.subr.bf16.mxu0 %v1642_v45 }
 0x111   : > { %1466 = vmatpush3.bf16.msra.mxu0 %v1642_v45 }
 0x112   : > { %1467 = vmatprep.subr.bf16.mxu0 %v1643_v46 }
 0x115   : > { %1468 = vmatpush3.bf16.msra.mxu0 %v1643_v46 }
 0x116   : > { %1469 = vmatprep.subr.bf16.mxu0 %v1644_v47 }
 0x119   : > { %1470 = vmatpush3.bf16.msra.mxu0 %v1644_v47 }
 0x11a   : > { %1471 = vmatprep.subr.bf16.mxu0 %v1645_v48 }
 0x11d   : > { %1472 = vmatpush3.bf16.msra.mxu0 %v1645_v48 }
 0x11e   : > { %1473 = vmatprep.subr.bf16.mxu0 %v1646_v49 }
 0x121   : > { %1474 = vmatpush3.bf16.msra.mxu0 %v1646_v49 }
 0x1d7   : > { %v1457_v28 = vpop.f32.mrb[0].mxu0 }
 0x1d8   : > { %v649_v29 = vadd.f32 %v1457_v28, %v1350_v27  ;;  %v640_v30 = vpop.f32.mrb[1].mxu0 }
 0x1d9   : > { %v641_v31 = vadd.f32 %v1350_v27, %v640_v30  ;;  %v1458_v32 = vpop.f32.mrb[2].mxu0 }
 0x1da   : > { %v652_v33 = vadd.f32 %v1458_v32, %v1350_v27  ;;  %v643_v34 = vpop.f32.mrb[3].mxu0  ;;  %v657_v36 = vmax.f32 %v649_v29, 0.0 }
 0x1db   : > { %v644_v35 = vadd.f32 %v1350_v27, %v643_v34  ;;  %v655_v38 = vmax.f32 %v641_v31, 0.0  ;;  %v836_v31 = vld [vmem:[%s2334_s17 + $0x10] sm:$0xff]  ;;  %v837_v34 = vld [vmem:[%s2334_s17 + $0x18] sm:$0xff]  ;;  %s1855_s17 = sshll.u32 %s1978_s22, 4  ;;  %s1856_s17 = int_to_ptr.vmem [resolvable:$false] %s1855_s17 }
 0x1dc   : > { %v658_v37 = vmax.f32 %v652_v33, 0.0  ;;  %s1857_s23 = scalar_lea.vmem %s1856_s17, 2048  ;;  %p1858_p10 = scmp.lt.s32.totalorder %s2379_s24, %s1856_s17 }
 0x1dd   : > { %v656_v39 = vmax.f32 %v644_v35, 0.0  ;;  %p1859_p5 = scmp.lt.s32.totalorder %s1857_s23, %s1851_s0 }
 0x1de   : > { %v660_v40 = vpack.c.bf16 %v658_v37, %v657_v36 }
 0x1df   : > { %v659_v41 = vpack.c.bf16 %v656_v39, %v655_v38  ;;  %p1860_p9 = por %p1859_p5, %p1858_p10 }
 0x1e1   : > { %802 = vmatmul.mubr.bf16.vlgmr.msra.gmra.mrb[0].mxu1 %v659_v41  ;;  %v1653_v41 = vld [vmem:[#allocation11 + $0x30] sm:$0xff]   ;;  %p1861_p4 = pnand %p1860_p9, %p1854_p8 }
 0x1e2   : > { %811 = vmatprep.mubr.bf16.mxu1 %v1977_v26  ;;  %1480 = vmatpush3.bf16.msra.mxu1 %v1647_v50 }
 0x1e3   : > { %1481 = vmatprep.subr.bf16.mxu1 %v1648_v51 }
 0x1e6   : > { %1482 = vmatpush3.bf16.msra.mxu1 %v1648_v51 }
 0x1e7   : > { %1483 = vmatprep.subr.bf16.mxu1 %v1649_v52 }
 0x1e9   : > { %812 = vmatmul.mubr.bf16.gmra.mrb[4].mxu1 %v660_v40 }
 0x1ea   : > { %1484 = vmatpush3.bf16.msra.mxu1 %v1649_v52 }
 0x1eb   : > { %1485 = vmatprep.subr.bf16.mxu1 %v1650_v53 }
 0x1ee   : > { %1486 = vmatpush3.bf16.msra.mxu1 %v1650_v53 }
 0x1ef   : > { %1487 = vmatprep.subr.bf16.mxu1 %v1651_v54 }
 0x1f2   : > { %1488 = vmatpush3.bf16.msra.mxu1 %v1651_v54 }
 0x1f3   : > { %1489 = vmatprep.subr.bf16.mxu1 %v1652_v55 }
 0x1f6   : > { %1490 = vmatpush3.bf16.msra.mxu1 %v1652_v55 }
 0x1f7   : > { %1491 = vmatprep.subr.bf16.mxu1 %v1653_v41 }
 0x1fa   : > { %1492 = vmatpush3.bf16.msra.mxu1 %v1653_v41 }
 0x1fb   : > { %1493 = vmatprep.subr.bf16.mxu1 %v1654_v42 }
 0x1fe   : > { %1494 = vmatpush3.bf16.msra.mxu1 %v1654_v42 }
 0x2b4   : > { %v803_v63 = vpop.f32.mrb[0].mxu1 }
 0x2b5   : > { %v804_v0 = vadd.f32 %v803_v63, %v682_v61  ;;  %v805_v1 = vpop.f32.mrb[1].mxu1 }
 0x2b6   : > { %v806_v2 = vadd.f32 %v805_v1, %v686_v62  ;;  %v807_v3 = vpop.f32.mrb[2].mxu1 }
 0x2b7   : > { %1118 = vst [vmem:[%s2361_s9] sm:$0xff] %v804_v0  ;;  %v808_v4 = vadd.f32 %v807_v3, %v682_v61  ;;  %v809_v5 = vpop.f32.mrb[3].mxu1 }
 0x2b8   : > { %v822_v6 = vmul.f32 0.5, %v806_v2  ;;  %1119 = vst [vmem:[%s2361_s9 + $0x8] sm:$0xff] %v806_v2  ;;  %v810_v7 = vadd.f32 %v809_v5, %v686_v62 }
 0x2b9   : > { %1120 = vst [vmem:[%s2361_s9 + $0x10] sm:$0xff] %v808_v4 }
 0x2ba   : > { %v826_v8 = vmul.f32 1.442695, %v822_v6  ;;  %v823_v9 = vmul.f32 0.5, %v810_v7  ;;  %1121 = vst [vmem:[%s2361_s9 + $0x18] sm:$0xff] %v810_v7 }
 0x2bc   : > { %1655 = vpow2.f32 %v826_v8  ;;  %v828_v10 = vmul.f32 1.442695, %v823_v9  ;;  %v813_v11 = vpop.f32.mrb[4].mxu1 }
 0x2bd   : > { %v814_v12 = vadd.f32 %v813_v11, %v682_v61  ;;  %v815_v13 = vpop.f32.mrb[5].mxu1 }
 0x2be   : > { %1657 = vpow2.f32 %v828_v10  ;;  %v816_v14 = vadd.f32 %v815_v13, %v686_v62  ;;  %v817_v15 = vpop.f32.mrb[6].mxu1 }
 0x2bf   : > { %1122 = vst [vmem:[%s2361_s9 + $0x20] sm:$0xff] %v814_v12  ;;  %v818_v16 = vadd.f32 %v817_v15, %v682_v61  ;;  %v819_v17 = vpop.f32.mrb[7].mxu1 }
 0x2c0   : > { %v824_v18 = vmul.f32 0.5, %v816_v14  ;;  %1123 = vst [vmem:[%s2361_s9 + $0x28] sm:$0xff] %v816_v14  ;;  %v820_v19 = vadd.f32 %v819_v17, %v686_v62 }
 0x2c1   : > { %1124 = vst [vmem:[%s2361_s9 + $0x30] sm:$0xff] %v818_v16 }
 0x2c2   : > { %v830_v20 = vmul.f32 1.442695, %v824_v18  ;;  %v825_v21 = vmul.f32 0.5, %v820_v19  ;;  %1125 = vst [vmem:[%s2361_s9 + $0x38] sm:$0xff] %v820_v19 }
 0x2c4   : > { %1659 = vpow2.f32 %v830_v20  ;;  %v832_v22 = vmul.f32 1.442695, %v825_v21 }
 0x2c6   : > { %v1656_v24 = vpop.eup %1655  ;;  %1661 = vpow2.f32 %v832_v22 }
 0x2c7   : > { %v838_v26 = vmul.f32 %v1656_v24, %v834_v23 }
 0x2c8   : > { %v1658_v27 = vpop.eup %1657 }
 0x2c9   : > { %v839_v28 = vmul.f32 %v1658_v27, %v835_v25  ;;  %v842_v29 = vadd.f32 %v838_v26, %v804_v0 }
 0x2cb   : > { %v843_v30 = vadd.f32 %v839_v28, %v808_v4 }
 0x2cd   : > { %v846_v32 = vpack.c.bf16 %v843_v30, %v842_v29 }
 0x2ce   : > { %v1660_v33 = vpop.eup %1659 }
 0x2cf   : > { %1475 = vmatprep.mubr.bf16.mxu0 %v846_v32  ;;  %v840_v35 = vmul.f32 %v1660_v33, %v836_v31 }
 0x2d0   : > { %v1662_v36 = vpop.eup %1661 }
 0x2d1   : > { %v841_v37 = vmul.f32 %v1662_v36, %v837_v34  ;;  %v844_v38 = vadd.f32 %v840_v35, %v814_v12 }
 0x2d3   : > { %v845_v39 = vadd.f32 %v841_v37, %v818_v16 }
 0x2d5   : > { %v847_v40 = vpack.c.bf16 %v845_v39, %v844_v38 }
 0x2d7   : > { %1476 = vmatmul.mubr.bf16.vlgmr.msra.gmra.mrb[4].mxu0 %v847_v40 }
 0x3aa   : > { %v1477_v44 = vpop.f32.mrb[4].mxu0 }
 0x3ab   : > { %v962_v45 = vadd.f32 %v1477_v44, %v1377_v43  ;;  %v953_v46 = vpop.f32.mrb[5].mxu0 }
 0x3ac   : > { %v954_v47 = vadd.f32 %v1377_v43, %v953_v46  ;;  %v1478_v48 = vpop.f32.mrb[6].mxu0 }
 0x3ad   : > { %v965_v49 = vadd.f32 %v1478_v48, %v1377_v43  ;;  %v956_v50 = vpop.f32.mrb[7].mxu0  ;;  %v970_v52 = vmax.f32 %v962_v45, 0.0 }
 0x3ae   : > { %v957_v51 = vadd.f32 %v1377_v43, %v956_v50  ;;  %v968_v54 = vmax.f32 %v954_v47, 0.0 }
 0x3af   : > { %v971_v53 = vmax.f32 %v965_v49, 0.0 }
 0x3b0   : > { %v969_v55 = vmax.f32 %v957_v51, 0.0 }
 0x3b1   : > { %v973_v56 = vpack.c.bf16 %v971_v53, %v970_v52 }
 0x3b2   : > { %v972_v57 = vpack.c.bf16 %v969_v55, %v968_v54 }
 0x3b4   : > { %1495 = vmatprep.mubr.bf16.mxu1 %v972_v57 }
 0x3b5   : > { %1496 = vmatmul.mubr.bf16.vlgmr.msra.gmra.mrb[8].mxu1 %v973_v56 }
 0x3b6   : > { %1864 = shalt.err (!%p1861_p4)
}
 0x3b7   : > { %s1865_s10 = scalar_lea.hbm %s2385_s4, 1024  ;;  %s1869_s16 = scalar_lea.hbm %s2477_s11, 2048 }
 0x3b8   : > { %p1866_p11 = scmp.ne.s32.totalorder %s2385_s4, %s1865_s10  ;;  %p1870_p1 = scmp.lt.u32.totalorder %s2385_s4, %s2477_s11 }
 0x3b9   : > { %p1871_p2 = scmp.lt.u32.totalorder %s1869_s16, %s1865_s10  ;;  %p1873_p0 = scmp.lt.u32.totalorder %s1865_s10, %s2385_s4 }
 0x3ba   : > { %p1867_p7 = pnand %p1866_p11, %p2222_p3 }
 0x3bb   : > { %p1872_p13 = por %p1871_p2, %p1870_p1 }
 0x3bc   : > { %p1868_p12 = pneg %p1867_p7 }
 0x3bd   : > { %p1874_p6 = por %p1873_p0, %p1872_p13 }
 0x3bf   : > { %p1875_p8 = pnand %p1874_p6, %p1868_p12 }
 0x3c1   : > { %1878 = shalt.err (!%p1875_p8)
}
 0x3c2   : > { %s1979_s30 = smov 256   ;;  %s1980_s8 = smov 16  }
 0x3c3   : > { %1520 = dma.vmem_to_hbm [thread:$0]  (%p2222_p3), %s2379_s24, 1024, %s2385_s4, %s1132_s2, %s1979_s30, %s1979_s30, %s1980_s8  }
 0x3c4   : > { %s2525_s0 = sld [smem:[#allocation30_spill]]  ;;  %s1406_s24 = sshll.u32 %s2065_s21, 9 }
 0x3c5   : > { %s506_s4 = scalar_lea.vmem [#allocation13], %s1343_s25  ;;  %s2526_s23 = sld [smem:[#allocation31_spill]] }
 0x3c6   : > { %s1145_s2 = sshll.u32 %s506_s4, 4  ;;  %s1127_s21 = scalar_lea.sflag [#allocation4], %s2320_s29  ;;  %s2422_s2 = int_to_ptr.vmem [resolvable:$true] %s1145_s2 }
 0x3c7   : > { %s1879_s25 = scalar_lea.vmem %s2422_s2, 512  ;;  %s1981_s14 = smov [#allocation13]  }
 0x3c8   : > { %p1880_p10 = scmp.ne.s32.totalorder %s2422_s2, %s1879_s25  ;;  %s1883_s27 = sshll.u32 %s1981_s14, 4  ;;  %s1884_s27 = int_to_ptr.vmem [resolvable:$false] %s1883_s27 }
 0x3c9   : > { %s1885_s16 = scalar_lea.vmem %s1884_s27, 1024  ;;  %p1886_p4 = scmp.lt.s32.totalorder %s2422_s2, %s1884_s27 }
 0x3ca   : > { %v1386_v58 = vld [vmem:[%s2525_s0] ss:$0 sm:$0xff]  ;;  %p1881_p5 = pnand %p1880_p10, %p2222_p3  ;;  %p1887_p11 = scmp.lt.s32.totalorder %s1885_s16, %s1879_s25 }
 0x3cb   : > { %s2420_s10 = scalar_lea.hbm %s2526_s23, %s1406_s24 }
 0x3cc   : > { %p1882_p9 = pneg %p1881_p5  ;;  %p1888_p7 = por %p1887_p11, %p1886_p4 }
 0x3ce   : > { %p1889_p12 = pnand %p1888_p7, %p1882_p9 }
 0x488   : > { %v1497_v59 = vpop.f32.mrb[8].mxu1 }
 0x489   : > { %v1088_v60 = vadd.f32 %v1497_v59, %v1386_v58  ;;  %v1079_v61 = vpop.f32.mrb[9].mxu1 }
 0x48a   : > { %v1080_v62 = vadd.f32 %v1386_v58, %v1079_v61  ;;  %v1498_v63 = vpop.f32.mrb[10].mxu1 }
 0x48b   : > { %v1096_v0 = vsub.f32 0.0, %v1088_v60  ;;  %v1091_v1 = vadd.f32 %v1498_v63, %v1386_v58  ;;  %v1082_v2 = vpop.f32.mrb[11].mxu1 }
 0x48c   : > { %v1094_v3 = vsub.f32 0.0, %v1080_v62  ;;  %v1083_v4 = vadd.f32 %v1386_v58, %v1082_v2 }
 0x48d   : > { %v1102_v5 = vmul.f32 1.442695, %v1096_v0  ;;  %v1097_v6 = vsub.f32 0.0, %v1091_v1 }
 0x48e   : > { %v1098_v7 = vmul.f32 1.442695, %v1094_v3  ;;  %v1095_v8 = vsub.f32 0.0, %v1083_v4 }
 0x48f   : > { %1663 = vpow2.f32 %v1102_v5  ;;  %v1104_v9 = vmul.f32 1.442695, %v1097_v6 }
 0x490   : > { %1665 = vpow2.f32 %v1098_v7  ;;  %v1100_v10 = vmul.f32 1.442695, %v1095_v8 }
 0x491   : > { %1667 = vpow2.f32 %v1104_v9 }
 0x492   : > { %1669 = vpow2.f32 %v1100_v10 }
 0x499   : > { %v1664_v11 = vpop.eup %1663 }
 0x49a   : > { %v1666_v12 = vpop.eup %1665  ;;  %v1108_v13 = vadd.f32 1.0, %v1664_v11 }
 0x49b   : > { %v1668_v14 = vpop.eup %1667  ;;  %v1106_v15 = vadd.f32 1.0, %v1666_v12 }
 0x49c   : > { %v1670_v16 = vpop.eup %1669  ;;  %1671 = vrcp.f32 %v1108_v13  ;;  %v1109_v17 = vadd.f32 1.0, %v1668_v14 }
 0x49d   : > { %1673 = vrcp.f32 %v1106_v15  ;;  %v1107_v18 = vadd.f32 1.0, %v1670_v16 }
 0x49e   : > { %1675 = vrcp.f32 %v1109_v17 }
 0x49f   : > { %1677 = vrcp.f32 %v1107_v18 }
 0x4a6   : > { %v1672_v19 = vpop.eup %1671 }
 0x4a7   : > { %v1674_v20 = vpop.eup %1673  ;;  %1116 = vst [vmem:[%s506_s4 + $0x10] sm:$0xff] %v1672_v19 }
 0x4a8   : > { %v1676_v21 = vpop.eup %1675  ;;  %1114 = vst [vmem:[%s506_s4] sm:$0xff] %v1674_v20 }
 0x4a9   : > { %v1678_v22 = vpop.eup %1677  ;;  %1117 = vst [vmem:[%s506_s4 + $0x18] sm:$0xff] %v1676_v21 }
 0x4aa   : > { %1115 = vst [vmem:[%s506_s4 + $0x8] sm:$0xff] %v1678_v22 }
 0x4ab   : > { %1892 = shalt.err (!%p1889_p12)
}
 0x4ac   : > { %s1893_s9 = scalar_lea.hbm %s2420_s10, 512  ;;  %s1897_s8 = scalar_lea.hbm %s2526_s23, 1024 }
 0x4ad   : > { %p1894_p1 = scmp.ne.s32.totalorder %s2420_s10, %s1893_s9  ;;  %p1898_p0 = scmp.lt.u32.totalorder %s2420_s10, %s2526_s23 }
 0x4ae   : > { %p1899_p6 = scmp.lt.u32.totalorder %s1897_s8, %s1893_s9  ;;  %p1901_p10 = scmp.lt.u32.totalorder %s1893_s9, %s2420_s10 }
 0x4af   : > { %p1895_p2 = pnand %p1894_p1, %p2222_p3 }
 0x4b0   : > { %p1900_p8 = por %p1899_p6, %p1898_p0 }
 0x4b1   : > { %p1896_p13 = pneg %p1895_p2 }
 0x4b2   : > { %p1902_p5 = por %p1901_p10, %p1900_p8 }
 0x4b4   : > { %p1903_p9 = pnand %p1902_p5, %p1896_p13 }
 0x4b6   : > { %1906 = shalt.err (!%p1903_p9)
}
 0x4b7   : > { %s1982_s0 = smov 128   ;;  %s1983_s24 = smov 8  }
 0x4b8   : > { %1519 = dma.vmem_to_hbm [thread:$0]  (%p2222_p3), %s2422_s2, 512, %s2420_s10, %s1127_s21, %s1982_s0, %s1982_s0, %s1983_s24  }
 0x4b9 PF: > { %s2527_s4 = sld [smem:[#allocation23_spill]]  ;;  %s2528_s22 = sld [smem:[#allocation24_spill]] }
 0x4ba   : > { %p2530_p11 = scmp.ge.s32.totalorder %s1965_s20, 2 }
 0x4bf   : > { %s1177_s17 = sand.u32 1, %s2527_s4   ;;  %p2529_p4 = scmp.ne.s32.totalorder %s2528_s22, 0 }
 0x4c0   : > { %s1178_s25 = scalar_lea.sflag [#allocation4], %s1177_s17 }
 0x4c1   : > { %p1544_p7 = pnand %p2530_p11, %p2529_p4 }
 0x4c3   : > { %1944 = dma.done.wait (!%p1544_p7), %s1178_s25, 512  }
 0x4c4   : > { %1946 = vsyncadd (!%p1544_p7), %s1178_s25, 4294966784  ;;  %s1187_s14 = scalar_lea.sflag [#allocation15], %s1177_s17 }
 0x4c5   : > { %1948 = dma.done.wait (!%p1544_p7), %s1187_s14, 1024  }
 0x4c6   : > { %1950 = vsyncadd (!%p1544_p7), %s1187_s14, 4294966272  ;;  %p33_p3 = scmp.ge.s32.totalorder %s2209_s28, 4   ;;  %s2531_s17 = smov %s1957_s18 }
 0x4c7   : > { %s2532_s18 = smov %s1961_s19  ;;  %s2533_s19 = smov %s2218_s26 }
 0x4c8   : > { %s2534_s20 = smov %s2209_s28  ;;  %35 = sbr.rel (!%p33_p3) target bundleno = 19 (0x13), region = 151 }
 0x4cf   :  { %1192 = vsyncpa [#allocation3], 1 }
 0x4d0   :  { %1194 = vsyncpa [#allocation3 + $0x1], 1 }
 0x4d1   :  { %1195 = vsyncpa [#allocation6], 1 }
 0x4d2   :  { %1197 = vsyncpa [#allocation6 + $0x1], 1 }
 0x4d3   :  { %1198 = vsyncpa [#allocation9], 1 }
 0x4d4   :  { %1199 = vsyncpa [#allocation12], 1 }
 0x4d5   :  { %1200 = vsyncpa [#allocation4], 1 }
 0x4d6   :  { %1202 = vsyncpa [#allocation4 + $0x1], 1 }
 0x4d7   :  { %1203 = vsyncpa [#allocation15], 1 }
 0x4d8   :  { %1205 = vsyncpa [#allocation15 + $0x1], 1 }

</bundles_post_ra>
